<compile_context>
chip_gen: v7x
topology: tpu7x:2x2x1
jax: 0.10.0
libtpu: 0.0.40
codegen_flags: <defaults>
</compile_context>

<pallas_src>
import functools

import jax
import jax.numpy as jnp
from jax import lax
from jax.experimental import pallas as pl
from jax.experimental.pallas import tpu as pltpu


def _mha_kernel(q_ref, k_ref, v_ref, o_ref, *, num_heads, d_head, scale):
    # q_ref/k_ref/v_ref/o_ref: (batch_block, S, H*D) VMEM tiles.
    bb = q_ref.shape[0]
    for b in range(bb):                      # static unroll (bb is small)
        q_all = q_ref[b]                     # (S, H*D), native dtype
        k_all = k_ref[b]
        v_all = v_ref[b]
        head_outs = []
        for h in range(num_heads):           # static unroll over heads
            lo, hi = h * d_head, (h + 1) * d_head
            q = q_all[:, lo:hi]              # (S, D)
            k = k_all[:, lo:hi]              # (S, D)
            v = v_all[:, lo:hi]              # (S, D)

            # scores = q @ k^T * d_kqv^-0.5 : contract the shared last dim directly
            # (no materialized transpose), f32 accumulation on the MXU.
            s = lax.dot_general(q, k, (((1,), (1,)), ((), ())),
                                preferred_element_type=jnp.float32) * scale

            # Numerically stable softmax over the key axis, kept in f32.
            s = s - jnp.max(s, axis=-1, keepdims=True)
            p = jnp.exp(s)
            p = p * pl.reciprocal(jnp.sum(p, axis=-1, keepdims=True), approx=True)

            # out = softmax(scores) @ v ; feed the MXU in the value dtype.
            o = lax.dot_general(p.astype(v.dtype), v, (((1,), (0,)), ((), ())),
                                preferred_element_type=jnp.float32)
            head_outs.append(o)

        # Single lane-dense (S, H*D) store per batch row.
        o_ref[b] = jnp.concatenate(head_outs, axis=-1).astype(o_ref.dtype)


def _choose_batch_block(batch, s, feat, itemsize, target_bytes=1 << 20):
    """Pick how many batch rows to process per grid step: tiles big enough to
    amortize per-step overhead, while keeping >=2 grid steps when possible so the
    'parallel' axis shards across both v7x TensorCores."""
    per_b = 4 * s * feat * itemsize          # q, k, v, out tiles per batch row
    bb = max(1, min(batch, target_bytes // max(per_b, 1)))
    if batch >= 2:
        bb = min(bb, batch // 2)
    bb = max(int(bb), 1)
    while batch % bb:                        # make it divide the batch exactly
        bb -= 1
    return bb


def mha_attention_core(q, k, v, num_heads, d_kqv):
    """q/k/v: (B, S, H*D) ('pre-permute' module layout).  Returns (B, S, H*D)."""
    B, S, F = q.shape
    assert F == num_heads * d_kqv
    assert k.shape == (B, S, F) and v.shape == (B, S, F)

    bb = _choose_batch_block(B, S, F, q.dtype.itemsize)
    grid = (B // bb,)

    kernel = functools.partial(_mha_kernel, num_heads=num_heads, d_head=d_kqv,
                               scale=float(d_kqv) ** (-0.5))

    spec = pl.BlockSpec((bb, S, F), lambda i: (i, 0, 0))

    return pl.pallas_call(
        kernel,
        out_shape=jax.ShapeDtypeStruct((B, S, F), q.dtype),
        grid_spec=pltpu.PrefetchScalarGridSpec(
            num_scalar_prefetch=0,
            grid=grid,
            in_specs=[spec, spec, spec],
            out_specs=spec,
        ),
        compiler_params=pltpu.CompilerParams(
            dimension_semantics=("parallel",),
        ),
    )(q, k, v)


def self_attention(query, key, value, d_kqv):
    """SelfAttention.forward (mask=None): query/key/value are (B, H, S, D)."""
    B, H, S, D = query.shape
    assert key.shape == (B, H, S, D) and value.shape == (B, H, S, D)
    # Lane-dense layout plumbing is done outside the kernel (wrapper-side
    # transpose/reshape is cheap XLA work; the kernel only sees H*D-wide slabs).
    to_bsf = lambda x: jnp.transpose(x, (0, 2, 1, 3)).reshape(B, S, H * D)
    out = mha_attention_core(to_bsf(query), to_bsf(key), to_bsf(value), H, d_kqv)
    return jnp.transpose(out.reshape(B, S, H, D), (0, 2, 1, 3))


def _reference(query, key, value, d_kqv):
    scores = jnp.einsum("bhqd,bhkd->bhqk", query.astype(jnp.float32),
                        key.astype(jnp.float32)) * (float(d_kqv) ** -0.5)
    p = jax.nn.softmax(scores, axis=-1)
    return jnp.einsum("bhqk,bhkd->bhqd", p, value.astype(jnp.float32))


if __name__ == "__main__":
    # Small shapes consistent with the module: batch=2, heads=4, seq=8, d_kqv=32
    # (H * d_kqv = 128 -> lane-dense kernel blocks).
    B, H, S, D = 2, 4, 8, 32
    d_kqv = D

    key0 = jax.random.PRNGKey(0)
    kq, kk, kv = jax.random.split(key0, 3)
    query = jax.random.normal(kq, (B, H, S, D), dtype=jnp.float32)
    keyt = jax.random.normal(kk, (B, H, S, D), dtype=jnp.float32)
    value = jax.random.normal(kv, (B, H, S, D), dtype=jnp.float32)

    # f32 path
    out = jax.block_until_ready(self_attention(query, keyt, value, d_kqv))
    ref = _reference(query, keyt, value, d_kqv)
    assert out.shape == (B, H, S, D)
    # tolerance slightly loosened for the approx (EUP) reciprocal in softmax
    assert jnp.allclose(out, ref, atol=5e-3, rtol=5e-3), \
        float(jnp.max(jnp.abs(out - ref)))

    # bf16 path: operands fed to the MXU in bf16, f32 accumulation / softmax.
    q16, k16, v16 = (x.astype(jnp.bfloat16) for x in (query, keyt, value))
    out16 = jax.block_until_ready(self_attention(q16, k16, v16, d_kqv))
    ref16 = _reference(q16, k16, v16, d_kqv)
    assert out16.shape == (B, H, S, D) and out16.dtype == jnp.bfloat16
    assert jnp.allclose(out16.astype(jnp.float32), ref16, atol=6e-2, rtol=6e-2), \
        float(jnp.max(jnp.abs(out16.astype(jnp.float32) - ref16)))

    print("KERNEL_OK")
</pallas_src>

<mosaic_0001>
module attributes {stable_mosaic.version = 11 : i64} {
  func.func @_mha_kernel(%arg0: i32, %arg1: memref<1x8x128xf32, #tpu.memory_space<vmem>>, %arg2: memref<1x8x128xf32, #tpu.memory_space<vmem>>, %arg3: memref<1x8x128xf32, #tpu.memory_space<vmem>>, %arg4: memref<1x8x128xf32, #tpu.memory_space<vmem>>) attributes {dimension_semantics = [#tpu.dimension_semantics<parallel>], iteration_bounds = array<i64: 2>, scalar_prefetch = 0 : i64, scratch_operands = 0 : i64, tpu.core_type = #tpu.core_type<tc>, window_params = [{transform_indices = @transform_0, window_bounds = array<i64: 1, 8, 128>}, {transform_indices = @transform_1, window_bounds = array<i64: 1, 8, 128>}, {transform_indices = @transform_2, window_bounds = array<i64: 1, 8, 128>}, {transform_indices = @transform_3, window_bounds = array<i64: 1, 8, 128>}]} {
    %c0 = arith.constant 0 : index
    %c0_0 = arith.constant 0 : index
    %c0_1 = arith.constant 0 : index
    %0 = vector.load %arg1[%c0, %c0_0, %c0_1] : memref<1x8x128xf32, #tpu.memory_space<vmem>>, vector<1x8x128xf32>
    %1 = vector.shape_cast %0 : vector<1x8x128xf32> to vector<8x128xf32>
    %c0_2 = arith.constant 0 : index
    %c0_3 = arith.constant 0 : index
    %c0_4 = arith.constant 0 : index
    %2 = vector.load %arg2[%c0_2, %c0_3, %c0_4] : memref<1x8x128xf32, #tpu.memory_space<vmem>>, vector<1x8x128xf32>
    %3 = vector.shape_cast %2 : vector<1x8x128xf32> to vector<8x128xf32>
    %c0_5 = arith.constant 0 : index
    %c0_6 = arith.constant 0 : index
    %c0_7 = arith.constant 0 : index
    %4 = vector.load %arg3[%c0_5, %c0_6, %c0_7] : memref<1x8x128xf32, #tpu.memory_space<vmem>>, vector<1x8x128xf32>
    %5 = vector.shape_cast %4 : vector<1x8x128xf32> to vector<8x128xf32>
    %6 = vector.extract_strided_slice %1 {offsets = [0, 0], sizes = [8, 32], strides = [1, 1]} : vector<8x128xf32> to vector<8x32xf32>
    %7 = vector.extract_strided_slice %3 {offsets = [0, 0], sizes = [8, 32], strides = [1, 1]} : vector<8x128xf32> to vector<8x32xf32>
    %8 = vector.extract_strided_slice %5 {offsets = [0, 0], sizes = [8, 32], strides = [1, 1]} : vector<8x128xf32> to vector<8x32xf32>
    %cst = arith.constant dense<0.000000e+00> : vector<8x8xf32>
    %9 = tpu.matmul %6, %7, %cst {dimension_numbers = #tpu.dot_dimension_numbers<[1], [1], [0], [0], [0, 0, 1, 0], [], []>} : vector<8x32xf32>, vector<8x32xf32>, vector<8x8xf32> -> vector<8x8xf32>
    %cst_8 = arith.constant 0.176776692 : f32
    %10 = vector.broadcast %cst_8 : f32 to vector<8x8xf32>
    %11 = arith.mulf %9, %10 : vector<8x8xf32>
    %cst_9 = arith.constant dense<0xFF800000> : vector<8xf32>
    %12 = vector.multi_reduction <maximumf>, %11, %cst_9 [1] : vector<8x8xf32> to vector<8xf32>
    %13 = vector.shape_cast %12 : vector<8xf32> to vector<8x1xf32>
    %14 = vector.broadcast %13 : vector<8x1xf32> to vector<8x8xf32>
    %15 = arith.subf %11, %14 : vector<8x8xf32>
    %16 = math.exp %15 : vector<8x8xf32>
    %cst_10 = arith.constant dense<0.000000e+00> : vector<8xf32>
    %17 = vector.multi_reduction <add>, %16, %cst_10 [1] : vector<8x8xf32> to vector<8xf32>
    %18 = vector.shape_cast %17 : vector<8xf32> to vector<8x1xf32>
    %19 = tpu.reciprocal %18 {approx = true} : vector<8x1xf32> -> vector<8x1xf32>
    %20 = vector.broadcast %19 : vector<8x1xf32> to vector<8x8xf32>
    %21 = arith.mulf %16, %20 : vector<8x8xf32>
    %cst_11 = arith.constant dense<0.000000e+00> : vector<8x32xf32>
    %22 = tpu.matmul %21, %8, %cst_11 {dimension_numbers = #tpu.dot_dimension_numbers<[1], [0], [0], [1], [0, 0, 1, 1], [], []>} : vector<8x8xf32>, vector<8x32xf32>, vector<8x32xf32> -> vector<8x32xf32>
    %23 = vector.extract_strided_slice %1 {offsets = [0, 32], sizes = [8, 32], strides = [1, 1]} : vector<8x128xf32> to vector<8x32xf32>
    %24 = vector.extract_strided_slice %3 {offsets = [0, 32], sizes = [8, 32], strides = [1, 1]} : vector<8x128xf32> to vector<8x32xf32>
    %25 = vector.extract_strided_slice %5 {offsets = [0, 32], sizes = [8, 32], strides = [1, 1]} : vector<8x128xf32> to vector<8x32xf32>
    %cst_12 = arith.constant dense<0.000000e+00> : vector<8x8xf32>
    %26 = tpu.matmul %23, %24, %cst_12 {dimension_numbers = #tpu.dot_dimension_numbers<[1], [1], [0], [0], [0, 0, 1, 0], [], []>} : vector<8x32xf32>, vector<8x32xf32>, vector<8x8xf32> -> vector<8x8xf32>
    %cst_13 = arith.constant 0.176776692 : f32
    %27 = vector.broadcast %cst_13 : f32 to vector<8x8xf32>
    %28 = arith.mulf %26, %27 : vector<8x8xf32>
    %cst_14 = arith.constant dense<0xFF800000> : vector<8xf32>
    %29 = vector.multi_reduction <maximumf>, %28, %cst_14 [1] : vector<8x8xf32> to vector<8xf32>
    %30 = vector.shape_cast %29 : vector<8xf32> to vector<8x1xf32>
    %31 = vector.broadcast %30 : vector<8x1xf32> to vector<8x8xf32>
    %32 = arith.subf %28, %31 : vector<8x8xf32>
    %33 = math.exp %32 : vector<8x8xf32>
    %cst_15 = arith.constant dense<0.000000e+00> : vector<8xf32>
    %34 = vector.multi_reduction <add>, %33, %cst_15 [1] : vector<8x8xf32> to vector<8xf32>
    %35 = vector.shape_cast %34 : vector<8xf32> to vector<8x1xf32>
    %36 = tpu.reciprocal %35 {approx = true} : vector<8x1xf32> -> vector<8x1xf32>
    %37 = vector.broadcast %36 : vector<8x1xf32> to vector<8x8xf32>
    %38 = arith.mulf %33, %37 : vector<8x8xf32>
    %cst_16 = arith.constant dense<0.000000e+00> : vector<8x32xf32>
    %39 = tpu.matmul %38, %25, %cst_16 {dimension_numbers = #tpu.dot_dimension_numbers<[1], [0], [0], [1], [0, 0, 1, 1], [], []>} : vector<8x8xf32>, vector<8x32xf32>, vector<8x32xf32> -> vector<8x32xf32>
    %40 = vector.extract_strided_slice %1 {offsets = [0, 64], sizes = [8, 32], strides = [1, 1]} : vector<8x128xf32> to vector<8x32xf32>
    %41 = vector.extract_strided_slice %3 {offsets = [0, 64], sizes = [8, 32], strides = [1, 1]} : vector<8x128xf32> to vector<8x32xf32>
    %42 = vector.extract_strided_slice %5 {offsets = [0, 64], sizes = [8, 32], strides = [1, 1]} : vector<8x128xf32> to vector<8x32xf32>
    %cst_17 = arith.constant dense<0.000000e+00> : vector<8x8xf32>
    %43 = tpu.matmul %40, %41, %cst_17 {dimension_numbers = #tpu.dot_dimension_numbers<[1], [1], [0], [0], [0, 0, 1, 0], [], []>} : vector<8x32xf32>, vector<8x32xf32>, vector<8x8xf32> -> vector<8x8xf32>
    %cst_18 = arith.constant 0.176776692 : f32
    %44 = vector.broadcast %cst_18 : f32 to vector<8x8xf32>
    %45 = arith.mulf %43, %44 : vector<8x8xf32>
    %cst_19 = arith.constant dense<0xFF800000> : vector<8xf32>
    %46 = vector.multi_reduction <maximumf>, %45, %cst_19 [1] : vector<8x8xf32> to vector<8xf32>
    %47 = vector.shape_cast %46 : vector<8xf32> to vector<8x1xf32>
    %48 = vector.broadcast %47 : vector<8x1xf32> to vector<8x8xf32>
    %49 = arith.subf %45, %48 : vector<8x8xf32>
    %50 = math.exp %49 : vector<8x8xf32>
    %cst_20 = arith.constant dense<0.000000e+00> : vector<8xf32>
    %51 = vector.multi_reduction <add>, %50, %cst_20 [1] : vector<8x8xf32> to vector<8xf32>
    %52 = vector.shape_cast %51 : vector<8xf32> to vector<8x1xf32>
    %53 = tpu.reciprocal %52 {approx = true} : vector<8x1xf32> -> vector<8x1xf32>
    %54 = vector.broadcast %53 : vector<8x1xf32> to vector<8x8xf32>
    %55 = arith.mulf %50, %54 : vector<8x8xf32>
    %cst_21 = arith.constant dense<0.000000e+00> : vector<8x32xf32>
    %56 = tpu.matmul %55, %42, %cst_21 {dimension_numbers = #tpu.dot_dimension_numbers<[1], [0], [0], [1], [0, 0, 1, 1], [], []>} : vector<8x8xf32>, vector<8x32xf32>, vector<8x32xf32> -> vector<8x32xf32>
    %57 = vector.extract_strided_slice %1 {offsets = [0, 96], sizes = [8, 32], strides = [1, 1]} : vector<8x128xf32> to vector<8x32xf32>
    %58 = vector.extract_strided_slice %3 {offsets = [0, 96], sizes = [8, 32], strides = [1, 1]} : vector<8x128xf32> to vector<8x32xf32>
    %59 = vector.extract_strided_slice %5 {offsets = [0, 96], sizes = [8, 32], strides = [1, 1]} : vector<8x128xf32> to vector<8x32xf32>
    %cst_22 = arith.constant dense<0.000000e+00> : vector<8x8xf32>
    %60 = tpu.matmul %57, %58, %cst_22 {dimension_numbers = #tpu.dot_dimension_numbers<[1], [1], [0], [0], [0, 0, 1, 0], [], []>} : vector<8x32xf32>, vector<8x32xf32>, vector<8x8xf32> -> vector<8x8xf32>
    %cst_23 = arith.constant 0.176776692 : f32
    %61 = vector.broadcast %cst_23 : f32 to vector<8x8xf32>
    %62 = arith.mulf %60, %61 : vector<8x8xf32>
    %cst_24 = arith.constant dense<0xFF800000> : vector<8xf32>
    %63 = vector.multi_reduction <maximumf>, %62, %cst_24 [1] : vector<8x8xf32> to vector<8xf32>
    %64 = vector.shape_cast %63 : vector<8xf32> to vector<8x1xf32>
    %65 = vector.broadcast %64 : vector<8x1xf32> to vector<8x8xf32>
    %66 = arith.subf %62, %65 : vector<8x8xf32>
    %67 = math.exp %66 : vector<8x8xf32>
    %cst_25 = arith.constant dense<0.000000e+00> : vector<8xf32>
    %68 = vector.multi_reduction <add>, %67, %cst_25 [1] : vector<8x8xf32> to vector<8xf32>
    %69 = vector.shape_cast %68 : vector<8xf32> to vector<8x1xf32>
    %70 = tpu.reciprocal %69 {approx = true} : vector<8x1xf32> -> vector<8x1xf32>
    %71 = vector.broadcast %70 : vector<8x1xf32> to vector<8x8xf32>
    %72 = arith.mulf %67, %71 : vector<8x8xf32>
    %cst_26 = arith.constant dense<0.000000e+00> : vector<8x32xf32>
    %73 = tpu.matmul %72, %59, %cst_26 {dimension_numbers = #tpu.dot_dimension_numbers<[1], [0], [0], [1], [0, 0, 1, 1], [], []>} : vector<8x8xf32>, vector<8x32xf32>, vector<8x32xf32> -> vector<8x32xf32>
    %74 = tpu.concatenate %22, %39, %56, %73 in 1 : vector<8x32xf32>, vector<8x32xf32>, vector<8x32xf32>, vector<8x32xf32> -> vector<8x128xf32>
    %c0_27 = arith.constant 0 : index
    %c0_28 = arith.constant 0 : index
    %c0_29 = arith.constant 0 : index
    %75 = vector.load %arg4[%c0_27, %c0_28, %c0_29] : memref<1x8x128xf32, #tpu.memory_space<vmem>>, vector<1x8x128xf32>
    %76 = vector.shape_cast %75 : vector<1x8x128xf32> to vector<8x128xf32>
    %77 = vector.shape_cast %74 : vector<8x128xf32> to vector<1x8x128xf32>
    tpu.vector_store %arg4[%c0_27, %c0_28, %c0_29], %77 {strides = array<i32>} : memref<1x8x128xf32, #tpu.memory_space<vmem>>, vector<1x8x128xf32>,
    return
  }
  func.func @transform_0(%arg0: i32) -> (i32, i32, i32) {
    %c0_i32 = arith.constant 0 : i32
    %c0_i32_0 = arith.constant 0 : i32
    %c0_i32_1 = arith.constant 0 : i32
    return %arg0, %c0_i32, %c0_i32_0 : i32, i32, i32
  }
  func.func @transform_1(%arg0: i32) -> (i32, i32, i32) {
    %c0_i32 = arith.constant 0 : i32
    %c0_i32_0 = arith.constant 0 : i32
    %c0_i32_1 = arith.constant 0 : i32
    return %arg0, %c0_i32, %c0_i32_0 : i32, i32, i32
  }
  func.func @transform_2(%arg0: i32) -> (i32, i32, i32) {
    %c0_i32 = arith.constant 0 : i32
    %c0_i32_0 = arith.constant 0 : i32
    %c0_i32_1 = arith.constant 0 : i32
    return %arg0, %c0_i32, %c0_i32_0 : i32, i32, i32
  }
  func.func @transform_3(%arg0: i32) -> (i32, i32, i32) {
    %c0_i32 = arith.constant 0 : i32
    %c0_i32_0 = arith.constant 0 : i32
    %c0_i32_1 = arith.constant 0 : i32
    return %arg0, %c0_i32, %c0_i32_0 : i32, i32, i32
  }
}

</mosaic_0001>

<bundles_post_ra>
// kernel: tpu_custom_call.1
= control target key start
LH: loop header
LB: loop body
LE: loop exit
PB: predicated region body
PF: predicated region fallthrough
CT: control target
= control target key end

     0   :  { %s1722_s0 = inlined_call_operand.hbm [shape: f32[2,8,128], index: 0, kind: input, shape index: {}]   ;;  %s1723_s1 = inlined_call_operand.hbm [shape: f32[2,8,128], index: 1, kind: input, shape index: {}]   ;;  %s1724_s2 = inlined_call_operand.hbm [shape: f32[2,8,128], index: 2, kind: input, shape index: {}]   ;;  %s1725_s3 = inlined_call_operand.hbm [shape: f32[2,8,128], index: 3, kind: output, shape index: {}]  }
   0x1   :  { %1730 = sst [smem:[#allocation12_spill]] %s1723_s1 }
   0x2   :  { %8 = vsyncpa [#allocation3], 0 }
   0x3   :  { %10 = vsyncpa [#allocation3 + $0x1], 0 }
   0x4   :  { %11 = vsyncpa [#allocation6], 0 }
   0x5   :  { %13 = vsyncpa [#allocation6 + $0x1], 0 }
   0x6   :  { %14 = vsyncpa [#allocation4], 0 }
   0x7   :  { %16 = vsyncpa [#allocation4 + $0x1], 0  ;;  %s1421_s12 = smov 0   ;;  %s1423_s13 = smov 0  }
   0x8   :  { %s1425_s14 = smov 0   ;;  %s1427_s15 = smov 0  }
   0x9 LB: > { %s1442_s16 = sadd.s32 4294967295, %s1390_s15   ;;  %s1067_s17 = sadd.s32 4294967294, %s1390_s15   ;;  %s1390_s15 = sphi %s1427_s15, %s1749_s15   ;;  %s1386_s14 = sphi %s1425_s14, %s1748_s14   ;;  %s1382_s13 = sphi %s1423_s13, %s1747_s13   ;;  %s1378_s12 = sphi %s1421_s12, %s1746_s12  }
   0xa   : > { %s1446_s18 = sadd.s32 1, %s1390_s15   ;;  %s29_s19 = sadd.s32 1, %s1386_s14 }
   0xb   : > { %s26_s20 = ssub.s32 %s1390_s15, %s1446_s18  ;;  %p36_p0 = scmp.ne.s32.totalorder %s1386_s14, %s1382_s13 }
   0xc   : > { %p27_p1 = scmp.eq.s32.totalorder %s26_s20, 0  ;;  %p37_p2 = scmp.eq.s32.totalorder %s1390_s15, 0 }
   0xd   : > { %p42_p3 = scmp.ne.s32.totalorder %s1382_s13, %s1378_s12  ;;  %p43_p4 = scmp.eq.s32.totalorder %s1442_s16, 0 }
   0xe   : > { %s1458_s21 = scalar_select %p27_p1, %s1386_s14, %s29_s19  }
   0xf   : > { %p38_p5 = por %p37_p2, %p36_p0  ;;  %p1460_p6 = por %p43_p4, %p42_p3 }
  0x10   : > { %p118_p7 = scmp.eq.s32.totalorder %s1442_s16, 1  ;;  %p124_p8 = scmp.eq.s32.totalorder %s1067_s17, 1 }
  0x11   : > { %s1731_s22 = scalar_select %p1460_p6, 1, 0 }
  0x12   : > { %p1175_p10 = scmp.lt.s32.totalorder %s1390_s15, 2  ;;  %p1467_p11 = por %p118_p7, %p36_p0 }
  0x13   : > { %p1471_p12 = por %p124_p8, %p42_p3  ;;  %s144_s25 = sand.u32 1, %s1386_s14  }
  0x14   : > { %s1732_s23 = scalar_select %p1467_p11, 1, 0 }
  0x15   : > { %s1733_s24 = scalar_select %p1471_p12, 1, 0 }
  0x16   : > { %s1477_s26 = sshll.u32 %s1390_s15, 7  ;;  %s1481_s27 = sshll.u32 %s144_s25, 3 }
  0x17   : > { %p1483_p13 = pnand %p1175_p10, %p38_p5  ;;  %s162_s29 = sand.u32 1, %s1390_s15  }
  0x18   : > { %s1735_s1 = sld [smem:[#allocation12_spill]]  ;;  %s166_s6 = scalar_lea.vmem [#allocation5], %s1481_s27 }
  0x19   : > { %s1734_s28 = scalar_select %p1483_p13, 1, 0 }
  0x1a   : > { %s173_s7 = sshll.u32 %s166_s6, 4  ;;  %s1498_s8 = scalar_lea.sflag [#allocation6], %s162_s29  ;;  %s1495_s7 = int_to_ptr.vmem [resolvable:$true] %s173_s7 }
  0x1b   : > { %p1504_p2 = pneg %p1483_p13 }
  0x1e   : > { %s1492_s5 = scalar_lea.hbm %s1735_s1, %s1477_s26  ;;  %s1235_s19 = scalar_lea.hbm %s1735_s1, 256 }
  0x1f   : > { %s1230_s9 = scalar_lea.hbm %s1492_s5, 128  ;;  %p1236_p5 = scmp.lt.u32.totalorder %s1492_s5, %s1735_s1 }
  0x20   : > { %p1231_p1 = scmp.ne.s32.totalorder %s1492_s5, %s1230_s9  ;;  %p1237_p7 = scmp.lt.u32.totalorder %s1235_s19, %s1230_s9 }
  0x21   : > { %p1239_p10 = scmp.lt.u32.totalorder %s1230_s9, %s1492_s5 }
  0x22   : > { %p1233_p3 = pnand %p1504_p2, %p1231_p1  ;;  %p1238_p8 = por %p1237_p7, %p1236_p5 }
  0x24   : > { %p1234_p4 = pneg %p1233_p3  ;;  %p1240_p9 = por %p1239_p10, %p1238_p8 }
  0x26   : > { %p1241_p0 = pnand %p1240_p9, %p1234_p4 }
  0x28   : > { %1244 = shalt.err (!%p1241_p0)
}
  0x29   : > { %s1245_s29 = scalar_lea.vmem %s1495_s7, 128  ;;  %s1392_s4 = smov [#allocation5]  }
  0x2a   : > { %p1246_p1 = scmp.ne.s32.totalorder %s1495_s7, %s1245_s29  ;;  %s1250_s6 = sshll.u32 %s1392_s4, 4  ;;  %s1251_s6 = int_to_ptr.vmem [resolvable:$false] %s1250_s6 }
  0x2b   : > { %s1252_s11 = scalar_lea.vmem %s1251_s6, 256  ;;  %p1253_p11 = scmp.lt.s32.totalorder %s1495_s7, %s1251_s6 }
  0x2c   : > { %p1248_p3 = pnand %p1246_p1, %p1504_p2  ;;  %p1254_p6 = scmp.lt.s32.totalorder %s1252_s11, %s1245_s29 }
  0x2e   : > { %p1249_p12 = pneg %p1248_p3  ;;  %p1255_p5 = por %p1254_p6, %p1253_p11 }
  0x30   : > { %p1256_p7 = pnand %p1255_p5, %p1249_p12 }
  0x32   : > { %1259 = shalt.err (!%p1256_p7)
}
  0x33   : > { %1167 = dma.hbm_to_vmem [thread:$0]  (!%p1483_p13), %s1492_s5, 128, %s1495_s7, %s1498_s8  }
  0x34   : > { %p196_p9 = scmp.lt.s32.totalorder %s1390_s15, 3  ;;  %s1533_s19 = scalar_lea.hbm %s1722_s0, %s1477_s26 }
  0x35   : > { %p1737_p6 = scmp.ge.s32.totalorder %s1390_s15, 1  ;;  %s148_s30 = scalar_lea.vmem [#allocation2], %s1481_s27 }
  0x36   : > { %s155_s29 = sshll.u32 %s148_s30, 4  ;;  %s145_s5 = scalar_lea.sflag [#allocation3], %s144_s25  ;;  %s156_s29 = int_to_ptr.vmem [resolvable:$true] %s155_s29 }
  0x37   : > { %p1537_p11 = pnand %p1737_p6, %p196_p9  ;;  %s1260_s7 = scalar_lea.hbm %s1533_s19, 128 }
  0x38   : > { %p1261_p12 = scmp.ne.s32.totalorder %s1533_s19, %s1260_s7  ;;  %s1265_s11 = scalar_lea.hbm %s1722_s0, 256 }
  0x39   : > { %s1738_s20 = scalar_select %p1537_p11, 1, 0 }
  0x3a   : > { %p1263_p0 = pnand %p1261_p12, %p1504_p2  ;;  %p1266_p8 = scmp.lt.u32.totalorder %s1533_s19, %s1722_s0 }
  0x3b   : > { %p1267_p10 = scmp.lt.u32.totalorder %s1265_s11, %s1260_s7  ;;  %p1269_p3 = scmp.lt.u32.totalorder %s1260_s7, %s1533_s19 }
  0x3c   : > { %p1264_p4 = pneg %p1263_p0 }
  0x3d   : > { %p1268_p1 = por %p1267_p10, %p1266_p8 }
  0x3f   : > { %p1270_p5 = por %p1269_p3, %p1268_p1 }
  0x41   : > { %p1271_p7 = pnand %p1270_p5, %p1264_p4 }
  0x43   : > { %1274 = shalt.err (!%p1271_p7)
}
  0x44   : > { %s1275_s25 = scalar_lea.vmem %s156_s29, 128  ;;  %s1393_s30 = smov [#allocation2]  }
  0x45   : > { %p1276_p9 = scmp.ne.s32.totalorder %s156_s29, %s1275_s25  ;;  %s1280_s1 = sshll.u32 %s1393_s30, 4  ;;  %s1281_s1 = int_to_ptr.vmem [resolvable:$false] %s1280_s1 }
  0x46   : > { %s1282_s4 = scalar_lea.vmem %s1281_s1, 256  ;;  %p1283_p0 = scmp.lt.s32.totalorder %s156_s29, %s1281_s1 }
  0x47   : > { %p1278_p6 = pnand %p1276_p9, %p1504_p2  ;;  %p1284_p11 = scmp.lt.s32.totalorder %s1282_s4, %s1275_s25 }
  0x49   : > { %p1279_p12 = pneg %p1278_p6  ;;  %p1285_p13 = por %p1284_p11, %p1283_p0 }
  0x4b   : > { %p1286_p8 = pnand %p1285_p13, %p1279_p12 }
  0x4d   : > { %1289 = shalt.err (!%p1286_p8)
}
  0x4e   : > { %p1739_p10 = scmp.ne.s32.totalorder %s1734_s28, 0  ;;  %s1565_s11 = scalar_lea.hbm %s1724_s2, %s1477_s26 }
  0x4f   : > { %s184_s1 = scalar_lea.vmem [#allocation7], %s1481_s27  ;;  %s1290_s17 = scalar_lea.hbm %s1565_s11, 128 }
  0x50   : > { %1164 = dma.hbm_to_vmem [thread:$0]  (!%p1739_p10), %s1533_s19, 128, %s156_s29, %s145_s5  }
  0x51   : > { %s191_s9 = sshll.u32 %s184_s1, 4  ;;  %p1291_p13 = scmp.ne.s32.totalorder %s1565_s11, %s1290_s17  ;;  %s192_s9 = int_to_ptr.vmem [resolvable:$true] %s191_s9 }
  0x52   : > { %s1295_s19 = scalar_lea.hbm %s1724_s2, 256  ;;  %p1296_p1 = scmp.lt.u32.totalorder %s1565_s11, %s1724_s2 }
  0x53   : > { %p1293_p11 = pnand %p1291_p13, %p1504_p2  ;;  %p1297_p3 = scmp.lt.u32.totalorder %s1295_s19, %s1290_s17 }
  0x54   : > { %p1299_p7 = scmp.lt.u32.totalorder %s1290_s17, %s1565_s11 }
  0x55   : > { %p1294_p4 = pneg %p1293_p11  ;;  %p1298_p5 = por %p1297_p3, %p1296_p1 }
  0x57   : > { %p1300_p9 = por %p1299_p7, %p1298_p5 }
  0x59   : > { %p1301_p6 = pnand %p1300_p9, %p1294_p4 }
  0x5b   : > { %1304 = shalt.err (!%p1301_p6)
}
  0x5c   : > { %s1305_s26 = scalar_lea.vmem %s192_s9, 128  ;;  %s1394_s27 = smov [#allocation7]  }
  0x5d   : > { %p1306_p12 = scmp.ne.s32.totalorder %s192_s9, %s1305_s26  ;;  %s1310_s4 = sshll.u32 %s1394_s27, 4  ;;  %s1311_s4 = int_to_ptr.vmem [resolvable:$false] %s1310_s4 }
  0x5e   : > { %s1312_s7 = scalar_lea.vmem %s1311_s4, 256  ;;  %p1313_p13 = scmp.lt.s32.totalorder %s192_s9, %s1311_s4 }
  0x5f   : > { %p1308_p0 = pnand %p1306_p12, %p1504_p2  ;;  %p1314_p11 = scmp.lt.s32.totalorder %s1312_s7, %s1305_s26 }
  0x61   : > { %p1309_p8 = pneg %p1308_p0  ;;  %p1315_p10 = por %p1314_p11, %p1313_p13 }
  0x63   : > { %p1316_p1 = pnand %p1315_p10, %p1309_p8 }
  0x65   : > { %1319 = shalt.err (!%p1316_p1)
}
  0x66   : > { %p1740_p3 = scmp.ne.s32.totalorder %s1734_s28, 0  ;;  %p1741_p4 = scmp.ne.s32.totalorder %s1738_s20, 0 }
  0x67   : > { %s1589_s10 = sand.u32 (!%p1741_p4), 1, %s1382_s13   ;;  %p1742_p2 = scmp.ne.s32.totalorder (!%p1741_p4), %s1731_s22, 0 }
  0x68   : > { %1170 = dma.hbm_to_vmem [thread:$0]  (!%p1740_p3), %s1565_s11, 128, %s192_s9, %s1498_s8  }
  0x69   : > { %200 = sbr.rel (%p1741_p4) target bundleno = 1577 (0x629), region = 32  ;;  %s1592_s6 = sshll.u32 (!%p1741_p4), %s1589_s10, 3 }
  0x6a   : > { %s203_s1 = scalar_lea.sflag (!%p1741_p4), [#allocation3], %s1589_s10  ;;  %s206_s17 = scalar_lea.vmem (!%p1741_p4), [#allocation2], %s1592_s6 }
  0x70   : > { %1365 = dma.done.wait (%p1742_p2), %s203_s1, 128  }
  0x71   : > { %1367 = vsyncadd (%p1742_p2), %s203_s1, 4294967168  ;;  %s211_s28 = sand.u32 1, %s1442_s16   ;;  %s215_s20 = scalar_lea.vmem [#allocation5], %s1592_s6 }
  0x72   : > { %s212_s8 = scalar_lea.sflag [#allocation6], %s211_s28 }
  0x73   : > { %1369 = dma.done.wait (%p1742_p2), %s212_s8, 256  }
  0x74   : > { %1371 = vsyncadd (%p1742_p2), %s212_s8, 4294967040  ;;  %v1395_v0 = vmov 0.0   ;;  %vm1396_vm0 = vmmov 0   ;;  %vm260_vm1 = vcmask 261120   ;;  %v258_v1 = vld [vmem:[%s215_s20] sm:$0xff]  ;;  %v257_v2 = vld [vmem:[%s206_s17] sm:$0xff] }
  0x75   : > { %1113 = vmatprep.subr.mxu0 %v1395_v0  ;;  %1115 = vmatprep.mubr.msk.f32.mxu0 %vm1396_vm0, %v1395_v0  ;;  %vm338_vm2 = vcmask 64512   ;;  %s1397_s22 = smov 96   ;;  %s1398_s11 = smov 64   ;;  %vm935_vm3 = vcmask 523264   ;;  %vm937_vm4 = vcmask 785408  }
  0x76   : > { %1118 = vmatprep.subr.mxu1 %v1395_v0  ;;  %1120 = vmatprep.mubr.msk.f32.mxu1 %vm1396_vm0, %v1395_v0  ;;  %s1399_s9 = smov 32   ;;  %s224_s25 = scalar_lea.vmem [#allocation7], %s1592_s6 }
  0x77   : > { %1114 = vmatpush3.xpose.msk.msra.mxu0 %vm260_vm1, %v258_v1  ;;  %425 = vrot.lane.b32.xlu1 %v258_v1, %s1397_s22  ;;  %v1625_v12 = vld [vmem:[%s224_s25] sm:$0xff]  ;;  %s1094_s30 = sshll.u32 %s1442_s16, 7  ;;  %s256_s19 = scalar_lea.vmem [#allocation8], %s1592_s6 }
  0x78   : > { %1128 = vmatprep.subr.mxu0 %v1395_v0  ;;  %1119 = vmatpush3.msra.mxu1 %v1625_v12  ;;  %s954_s29 = sshll.u32 %s256_s19, 4  ;;  %s1678_s27 = scalar_lea.hbm %s1725_s3, %s1094_s30  ;;  %s1680_s29 = int_to_ptr.vmem [resolvable:$true] %s954_s29 }
  0x79   : > { %1123 = vmatprep.subr.mxu1 %v1395_v0  ;;  %s941_s16 = scalar_lea.sflag [#allocation4], %s1589_s10  ;;  %s1320_s4 = scalar_lea.vmem %s1680_s29, 128 }
  0x7a   : > { %1116 = vmatmul.mubr.msk.f32.vlgmr.msra.gmra.mrb[0].mxu0 %vm260_vm1, %v257_v2  ;;  %p1321_p10 = scmp.ne.s32.totalorder %s1680_s29, %s1320_s4  ;;  %p1743_p5 = scmp.ne.s32.totalorder %s1732_s23, 0 }
  0x7b   : > { %1130 = vmatprep.mubr.msk.f32.mxu0 %vm1396_vm0, %v1395_v0  ;;  %423 = vrot.lane.b32.xlu1 %v257_v2, %s1397_s22  ;;  %s1400_s7 = smov [#allocation8]  }
  0x7c   : > { %p1322_p7 = pnand %p1321_p10, %p1743_p5  ;;  %s1324_s6 = sshll.u32 %s1400_s7, 4  ;;  %s1325_s6 = int_to_ptr.vmem [resolvable:$false] %s1324_s6 }
  0x7d   : > { %s1326_s1 = scalar_lea.vmem %s1325_s6, 256  ;;  %p1327_p6 = scmp.lt.s32.totalorder %s1680_s29, %s1325_s6 }
  0x7e   : > { %p1323_p9 = pneg %p1322_p7  ;;  %p1328_p12 = scmp.lt.s32.totalorder %s1326_s1, %s1320_s4 }
  0x7f   : > { %590 = vrot.lane.b32.xlu1 %v257_v2, %s1398_s11 }
  0x80   : > { %p1329_p0 = por %p1328_p12, %p1327_p6 }
  0x82   : > { %p1330_p8 = pnand %p1329_p0, %p1323_p9 }
  0x83   : > { %758 = vrot.lane.b32.xlu1 %v258_v1, %s1399_s9 }
  0x87   : > { %756 = vrot.lane.b32.xlu1 %v257_v2, %s1399_s9 }
  0xe9   : > { %v426_v13 = vpop.permute.xlu1 %425 }
  0xed   : > { %v424_v15 = vpop.permute.xlu1 %423 }
  0xf1   : > { %v591_v17 = vpop.permute.xlu1 %590 }
  0xf5   : > { %v759_v20 = vpop.permute.xlu1 %758 }
  0xf9   : > { %v757_v21 = vpop.permute.xlu1 %756 }
 0x14d   : > { %v333_v3 = vpop.f32.mrb[0].mxu0 }
 0x14e   : > { %v337_v4 = vmul.f32 0.17677669, %v333_v3  ;;  %v1117_v5 = vpop.f32.mrb[1].mxu0 }
 0x150   : > { %v339_v6 = vsel %vm338_vm2, %v337_v4, -inf }
 0x151   : > { %340 = vmax.xlane.f32.xlu0 %v339_v6 }
 0x1de   : > { %v341_v7 = vpop.xlane.xlu0 %340 }
 0x1df   : > { %v342_v8 = vsub.f32 %v337_v4, %v341_v7 }
 0x1e1   : > { %v343_v9 = vmul.f32 1.442695, %v342_v8 }
 0x1e3   : > { %1214 = vpow2.f32 %v343_v9 }
 0x1ed   : > { %v1215_v10 = vpop.eup %1214 }
 0x1ee   : > { %v345_v11 = vsel %vm338_vm2, %v1215_v10, 0.0 }
 0x1ef   : > { %346 = vadd.xlane.f32.xlu0 %v345_v11 }
 0x205   : > { %592 = vrot.lane.b32.xlu0 %v258_v1, %s1398_s11 }
 0x27c   : > { %v347_v14 = vpop.xlane.xlu0 %346 }
 0x27d   : > { %1216 = vrcp.f32 %v347_v14 }
 0x280   : > { %v593_v19 = vpop.permute.xlu0 %592 }
 0x287   : > { %v1217_v16 = vpop.eup %1216 }
 0x288   : > { %v349_v18 = vmul.f32 %v1217_v16, %v1215_v10 }
 0x28a   : > { %1121 = vmatmul.mubr.msk.f32.vlgmr.msra.gmra.mrb[0].mxu1 %vm338_vm2, %v349_v18 }
 0x28b   : > { %1124 = vmatpush3.xpose.msk.msra.mxu1 %vm260_vm1, %v426_v13  ;;  %1125 = vmatprep.mubr.msk.f32.mxu1 %vm1396_vm0, %v1395_v0 }
 0x28c   : > { %1133 = vmatprep.subr.mxu1 %v1395_v0 }
 0x28e   : > { %1126 = vmatmul.mubr.msk.f32.vlgmr.msra.gmra.mrb[2].mxu1 %vm260_vm1, %v424_v15 }
 0x28f   : > { %1134 = vmatpush3.xpose.msk.msra.mxu1 %vm260_vm1, %v593_v19  ;;  %1135 = vmatprep.mubr.msk.f32.mxu1 %vm1396_vm0, %v1395_v0 }
 0x290   : > { %1143 = vmatprep.subr.mxu1 %v1395_v0 }
 0x292   : > { %1136 = vmatmul.mubr.msk.f32.vlgmr.msra.gmra.mrb[4].mxu1 %vm260_vm1, %v591_v17 }
 0x293   : > { %1144 = vmatpush3.xpose.msk.msra.mxu1 %vm260_vm1, %v759_v20  ;;  %1145 = vmatprep.mubr.msk.f32.mxu1 %vm1396_vm0, %v1395_v0 }
 0x296   : > { %1146 = vmatmul.mubr.msk.f32.vlgmr.msra.gmra.mrb[6].mxu1 %vm260_vm1, %v757_v21 }
 0x35d   : > { %v1645_v22 = vpop.f32.mrb[0].mxu1 }
 0x35e   : > { %v1122_v23 = vpop.f32.mrb[1].mxu1 }
 0x361   : > { %v497_v24 = vpop.f32.mrb[2].mxu1 }
 0x362   : > { %v501_v25 = vmul.f32 0.17677669, %v497_v24  ;;  %v1127_v26 = vpop.f32.mrb[3].mxu1 }
 0x364   : > { %v502_v27 = vsel %vm338_vm2, %v501_v25, -inf }
 0x365   : > { %503 = vmax.xlane.f32.xlu1 %v502_v27  ;;  %v664_v28 = vpop.f32.mrb[4].mxu1 }
 0x366   : > { %v668_v29 = vmul.f32 0.17677669, %v664_v28  ;;  %v1137_v30 = vpop.f32.mrb[5].mxu1 }
 0x368   : > { %v669_v31 = vsel %vm338_vm2, %v668_v29, -inf }
 0x369   : > { %670 = vmax.xlane.f32.xlu0 %v669_v31  ;;  %v830_v32 = vpop.f32.mrb[6].mxu1 }
 0x36a   : > { %v834_v33 = vmul.f32 0.17677669, %v830_v32  ;;  %v1147_v34 = vpop.f32.mrb[7].mxu1 }
 0x36c   : > { %v835_v35 = vsel %vm338_vm2, %v834_v33, -inf }
 0x36d   : > { %836 = vmax.xlane.f32.xlu1 %v835_v35 }
 0x3f2   : > { %v504_v36 = vpop.xlane.xlu1 %503 }
 0x3f3   : > { %v505_v37 = vsub.f32 %v501_v25, %v504_v36 }
 0x3f5   : > { %v506_v38 = vmul.f32 1.442695, %v505_v37 }
 0x3f6   : > { %v671_v39 = vpop.xlane.xlu0 %670 }
 0x3f7   : > { %1218 = vpow2.f32 %v506_v38  ;;  %v672_v40 = vsub.f32 %v668_v29, %v671_v39 }
 0x3f9   : > { %v673_v41 = vmul.f32 1.442695, %v672_v40 }
 0x3fa   : > { %v837_v46 = vpop.xlane.xlu1 %836 }
 0x3fb   : > { %1220 = vpow2.f32 %v673_v41  ;;  %v838_v47 = vsub.f32 %v834_v33, %v837_v46 }
 0x3fd   : > { %v839_v48 = vmul.f32 1.442695, %v838_v47 }
 0x3ff   : > { %1222 = vpow2.f32 %v839_v48 }
 0x401   : > { %v1219_v42 = vpop.eup %1218 }
 0x402   : > { %v508_v43 = vsel %vm338_vm2, %v1219_v42, 0.0 }
 0x403   : > { %509 = vadd.xlane.f32.xlu1 %v508_v43 }
 0x405   : > { %v1221_v44 = vpop.eup %1220 }
 0x406   : > { %v675_v45 = vsel %vm338_vm2, %v1221_v44, 0.0 }
 0x407   : > { %676 = vadd.xlane.f32.xlu0 %v675_v45 }
 0x409   : > { %v1223_v49 = vpop.eup %1222 }
 0x40a   : > { %v841_v50 = vsel %vm338_vm2, %v1223_v49, 0.0 }
 0x414   : > { %680 = vrot.lane.b32.xlu1 %v1625_v12, %s1398_s11 }
 0x41d   : > { %514 = vrot.lane.b32.xlu0 %v1625_v12, %s1397_s22 }
 0x438   : > { %842 = vadd.xlane.f32.xlu1 %v841_v50 }
 0x449   : > { %846 = vrot.lane.b32.xlu1 %v1625_v12, %s1399_s9 }
 0x490   : > { %v510_v51 = vpop.xlane.xlu1 %509 }
 0x491   : > { %1224 = vrcp.f32 %v510_v51 }
 0x494   : > { %v677_v52 = vpop.xlane.xlu0 %676  ;;  %v681_v56 = vpop.permute.xlu1 %680 }
 0x495   : > { %1226 = vrcp.f32 %v677_v52 }
 0x498   : > { %v515_v53 = vpop.permute.xlu0 %514 }
 0x499   : > { %1129 = vmatpush3.msra.mxu0 %v515_v53 }
 0x49a   : > { %1138 = vmatprep.subr.mxu0 %v1395_v0 }
 0x49b   : > { %v1225_v54 = vpop.eup %1224 }
 0x49c   : > { %v512_v55 = vmul.f32 %v1225_v54, %v1219_v42 }
 0x49e   : > { %1131 = vmatmul.mubr.msk.f32.vlgmr.msra.gmra.mrb[2].mxu0 %vm338_vm2, %v512_v55 }
 0x49f   : > { %v1227_v57 = vpop.eup %1226  ;;  %1139 = vmatpush3.msra.mxu0 %v681_v56  ;;  %1140 = vmatprep.mubr.msk.f32.mxu0 %vm1396_vm0, %v1395_v0 }
 0x4a0   : > { %v679_v58 = vmul.f32 %v1227_v57, %v1221_v44  ;;  %1148 = vmatprep.subr.mxu0 %v1395_v0 }
 0x4a2   : > { %1141 = vmatmul.mubr.msk.f32.vlgmr.msra.gmra.mrb[4].mxu0 %vm338_vm2, %v679_v58 }
 0x4a3   : > { %1150 = vmatprep.mubr.msk.f32.mxu0 %vm1396_vm0, %v1395_v0 }
 0x4c5   : > { %v843_v59 = vpop.xlane.xlu1 %842 }
 0x4c6   : > { %1228 = vrcp.f32 %v843_v59 }
 0x4c9   : > { %v847_v60 = vpop.permute.xlu1 %846 }
 0x4ca   : > { %1149 = vmatpush3.msra.mxu0 %v847_v60 }
 0x4d0   : > { %v1229_v61 = vpop.eup %1228 }
 0x4d1   : > { %v845_v62 = vmul.f32 %v1229_v61, %v1223_v49 }
 0x4d3   : > { %1151 = vmatmul.mubr.msk.f32.vlgmr.msra.gmra.mrb[6].mxu0 %vm338_vm2, %v845_v62 }
 0x571   : > { %v586_v63 = vpop.f32.mrb[2].mxu0 }
 0x572   : > { %923 = vrot.lane.b32.xlu0 %v586_v63, %s1399_s9  ;;  %v1132_v1 = vpop.f32.mrb[3].mxu0 }
 0x575   : > { %v752_v2 = vpop.f32.mrb[4].mxu0 }
 0x576   : > { %927 = vrot.lane.b32.xlu1 %v752_v2, %s1398_s11  ;;  %v1142_v3 = vpop.f32.mrb[5].mxu0 }
 0x5a6   : > { %v918_v4 = vpop.f32.mrb[6].mxu0 }
 0x5a7   : > { %931 = vrot.lane.b32.xlu0 %v918_v4, %s1397_s22  ;;  %v1152_v0 = vpop.f32.mrb[7].mxu0 }
 0x5e4   : > { %v924_v5 = vpop.permute.xlu0 %923 }
 0x5e5   : > { %v934_v7 = vsel %vm260_vm1, %v1645_v22, %v924_v5 }
 0x5e8   : > { %v928_v6 = vpop.permute.xlu1 %927 }
 0x5e9   : > { %v936_v8 = vsel %vm935_vm3, %v934_v7, %v928_v6 }
 0x619   : > { %v932_v9 = vpop.permute.xlu0 %931 }
 0x61a   : > { %v938_v10 = vsel %vm937_vm4, %v936_v8, %v932_v9 }
 0x61b   : > { %939 = vst [vmem:[%s256_s19] sm:$0xff] %v938_v10 }
 0x61c   : > { %1333 = shalt.err (!%p1330_p8)
}
 0x61d   : > { %s1334_s10 = scalar_lea.hbm %s1678_s27, 128  ;;  %s1338_s8 = scalar_lea.hbm %s1725_s3, 256 }
 0x61e   : > { %p1335_p13 = scmp.ne.s32.totalorder %s1678_s27, %s1334_s10  ;;  %p1339_p3 = scmp.lt.u32.totalorder %s1678_s27, %s1725_s3 }
 0x61f   : > { %p1340_p4 = scmp.lt.u32.totalorder %s1338_s8, %s1334_s10  ;;  %p1342_p10 = scmp.lt.u32.totalorder %s1334_s10, %s1678_s27 }
 0x620   : > { %p1336_p11 = pnand %p1335_p13, %p1743_p5 }
 0x621   : > { %p1341_p2 = por %p1340_p4, %p1339_p3 }
 0x622   : > { %p1337_p1 = pneg %p1336_p11 }
 0x623   : > { %p1343_p7 = por %p1342_p10, %p1341_p2 }
 0x625   : > { %p1344_p9 = pnand %p1343_p7, %p1337_p1 }
 0x627   : > { %1347 = shalt.err (!%p1344_p9)
}
 0x628   : > { %1159 = dma.vmem_to_hbm [thread:$0]  (%p1743_p5), %s1680_s29, 128, %s1678_s27, %s941_s16  }
 0x629 PF: > { %s966_s11 = sand.u32 1, %s1378_s12   ;;  %p1744_p6 = scmp.ne.s32.totalorder %s1733_s24, 0 }
 0x62a   : > { %p1745_p12 = scmp.ge.s32.totalorder %s1390_s15, 2  ;;  %s967_s9 = scalar_lea.sflag [#allocation4], %s966_s11 }
 0x62c   : > { %p1172_p0 = pnand %p1745_p12, %p1744_p6 }
 0x62e   : > { %1373 = dma.done.wait (!%p1172_p0), %s967_s9, 128  }
 0x62f   : > { %1375 = vsyncadd (!%p1172_p0), %s967_s9, 4294967168  ;;  %p19_p8 = scmp.ge.s32.totalorder %s1446_s18, 4   ;;  %s1746_s12 = smov %s1382_s13 }
 0x630   : > { %s1747_s13 = smov %s1386_s14  ;;  %s1748_s14 = smov %s1458_s21 }
 0x631   : > { %s1749_s15 = smov %s1446_s18  ;;  %21 = sbr.rel (!%p19_p8) target bundleno = 9 (0x9), region = 101 }
 0x638   :  { %972 = vsyncpa [#allocation3], 1 }
 0x639   :  { %974 = vsyncpa [#allocation3 + $0x1], 1 }
 0x63a   :  { %975 = vsyncpa [#allocation6], 1 }
 0x63b   :  { %977 = vsyncpa [#allocation6 + $0x1], 1 }
 0x63c   :  { %978 = vsyncpa [#allocation4], 1 }
 0x63d   :  { %980 = vsyncpa [#allocation4 + $0x1], 1 }

</bundles_post_ra>
